<compile_context>
chip_gen: v7x
topology: tpu7x:2x2x1
jax: 0.10.0
libtpu: 0.0.40
codegen_flags: <defaults>
</compile_context>

<pallas_src>
import functools
import math

import jax
import jax.numpy as jnp
from jax.experimental import pallas as pl
from jax.experimental.pallas import tpu as pltpu


def _sigmoid(z):
    # sigmoid(z) == 0.5*tanh(0.5*z)+0.5 : one EUP transcendental, no divide.
    return 0.5 * jnp.tanh(0.5 * z) + 0.5


def _mlp_kernel(x_ref, w1_ref, b1_ref, w2_ref, b2_ref, o_ref, *, compute_dtype):
    x = x_ref[...]
    if compute_dtype is not None and x.dtype != compute_dtype:
        x = x.astype(compute_dtype)          # cast in VMEM; HBM stream stays f32
    # hidden = sigmoid(x_packed @ W1_blk + b1_blk)
    h = jax.lax.dot_general(
        x, w1_ref[...],
        dimension_numbers=(((1,), (0,)), ((), ())),
        preferred_element_type=jnp.float32)
    h = _sigmoid(h + b1_ref[...])            # f32 bias add + sigmoid (VPU/EUP)
    h = h.astype(w2_ref.dtype)
    # out = sigmoid(hidden @ W2_blk + b2_blk)
    o = jax.lax.dot_general(
        h, w2_ref[...],
        dimension_numbers=(((1,), (0,)), ((), ())),
        preferred_element_type=jnp.float32)
    o = _sigmoid(o + b2_ref[...])
    o_ref[...] = o.astype(o_ref.dtype)
    # TODO(synk): sub-chunk the tile with lax.fori_loop(unroll=True) if bundle
    # profiling ever shows ld/st slots on the hidden round-trip as the limiter.


def _round_up(n, m):
    return ((n + m - 1) // m) * m


def _pack_factor(n_feature, n_hidden, n_output, max_packed_lanes=2048):
    """Number of batch rows folded into the lane axis so that both the packed
    feature width and the packed output width are multiples of 128 (lane-dense
    loads and unmasked stores). Falls back to 1 if packing isn't clean."""
    def need(n):
        return 128 // math.gcd(128, n)
    a, b = need(n_feature), need(n_output)
    p = a * b // math.gcd(a, b)              # lcm
    if p > 128 or p * max(n_feature, n_hidden, n_output) > max_packed_lanes:
        return 1
    return p


@functools.partial(jax.jit, static_argnames=("tile_rows_max", "compute_dtype"))
def ini_bp_net_forward(x, w_hidden, b_hidden, w_output, b_output,
                       *, tile_rows_max=2048, compute_dtype=None):
    """Forward pass of ini_BP_net.

    x:        (B, n_feature)
    w_hidden: (n_hidden, n_feature)   [PyTorch nn.Linear layout]
    b_hidden: (n_hidden,)
    w_output: (n_output, n_hidden)
    b_output: (n_output,)
    compute_dtype: optional narrower MXU-operand dtype (e.g. jnp.bfloat16);
        the cast happens inside the kernel, accumulation/bias/sigmoid stay f32.
    """
    B, n_feature = x.shape
    n_hidden = w_hidden.shape[0]
    n_output = w_output.shape[0]
    out_dtype = x.dtype

    P = _pack_factor(n_feature, n_hidden, n_output)
    kf, kh, ko = P * n_feature, P * n_hidden, P * n_output

    # One-time tiny weight prep (a few hundred KiB): transpose to (in, out)
    # and expand to block-diagonal packed form kron(I_P, W^T).
    w_dtype = compute_dtype if compute_dtype is not None else x.dtype
    eye = jnp.eye(P, dtype=w_dtype)
    w1_blk = jnp.kron(eye, w_hidden.T.astype(w_dtype))          # (kf, kh)
    w2_blk = jnp.kron(eye, w_output.T.astype(w_dtype))          # (kh, ko)
    b1_blk = jnp.tile(b_hidden.astype(jnp.float32), P).reshape(1, kh)
    b2_blk = jnp.tile(b_output.astype(jnp.float32), P).reshape(1, ko)

    # Batch tiling over packed rows (P original rows per packed row).
    rows = pl.cdiv(B, P)
    rows8 = _round_up(rows, 8)                       # f32 sublane granularity
    num_tiles = max(1, pl.cdiv(rows8, tile_rows_max))
    if rows8 >= 16:
        num_tiles = max(num_tiles, 2)                # keep both v7x TCs busy
    tile_rows = _round_up(pl.cdiv(rows8, num_tiles), 8)
    rows_padded = num_tiles * tile_rows
    b_padded = rows_padded * P

    if b_padded != B:
        x = jnp.pad(x, ((0, b_padded - B), (0, 0)))  # bounded, few rows
    x_packed = x.reshape(rows_padded, kf)            # free row-major reshape

    flops = 2 * rows_padded * (kf * kh + kh * ko)
    transcendentals = rows_padded * (kh + ko)
    bytes_accessed = (
        x_packed.size * x_packed.dtype.itemsize
        + rows_padded * ko * jnp.dtype(out_dtype).itemsize
        + w1_blk.size * w1_blk.dtype.itemsize
        + w2_blk.size * w2_blk.dtype.itemsize
        + (kh + ko) * 4)

    kernel = functools.partial(_mlp_kernel, compute_dtype=compute_dtype)

    out_packed = pl.pallas_call(
        kernel,
        out_shape=jax.ShapeDtypeStruct((rows_padded, ko), out_dtype),
        grid=(num_tiles,),
        in_specs=[
            # x streams through VMEM, double-buffered by the pipeline.
            pl.BlockSpec((tile_rows, kf), lambda i: (i, 0)),
            # Weights / biases: constant index_map -> resident across iters.
            pl.BlockSpec((kf, kh), lambda i: (0, 0)),
            pl.BlockSpec((1, kh), lambda i: (0, 0)),
            pl.BlockSpec((kh, ko), lambda i: (0, 0)),
            pl.BlockSpec((1, ko), lambda i: (0, 0)),
        ],
        out_specs=pl.BlockSpec((tile_rows, ko), lambda i: (i, 0)),
        compiler_params=pltpu.CompilerParams(
            dimension_semantics=("parallel",),
            vmem_limit_bytes=32 * 1024 * 1024),
        cost_estimate=pl.CostEstimate(
            flops=flops,
            transcendentals=transcendentals,
            bytes_accessed=bytes_accessed),
    )(x_packed, w1_blk, b1_blk, w2_blk, b2_blk)

    out = out_packed.reshape(b_padded, n_output)
    if b_padded != B:
        out = out[:B]
    return out


def _init_linear(key, out_features, in_features, dtype=jnp.float32):
    # Mimic PyTorch nn.Linear default init: U(-k, k), k = 1/sqrt(in_features).
    k = 1.0 / math.sqrt(in_features)
    kw, kb = jax.random.split(key)
    w = jax.random.uniform(kw, (out_features, in_features), dtype, -k, k)
    b = jax.random.uniform(kb, (out_features,), dtype, -k, k)
    return w, b


def _reference(x, w_hidden, b_hidden, w_output, b_output):
    return jax.nn.sigmoid(
        jax.nn.sigmoid(x @ w_hidden.T + b_hidden) @ w_output.T + b_output)


if __name__ == "__main__":
    n_feature, n_hidden, n_output = 16, 32, 8
    batch = 64

    key = jax.random.PRNGKey(0)
    kx, kh, ko = jax.random.split(key, 3)

    x = jax.random.normal(kx, (batch, n_feature), jnp.float32)
    w_hidden, b_hidden = _init_linear(kh, n_hidden, n_feature)
    w_output, b_output = _init_linear(ko, n_output, n_hidden)

    ref = _reference(x, w_hidden, b_hidden, w_output, b_output)

    # 1) f32 path (math parity with the PyTorch module).
    out = jax.block_until_ready(
        ini_bp_net_forward(x, w_hidden, b_hidden, w_output, b_output))
    assert out.shape == (batch, n_output)
    assert jnp.allclose(out, ref, atol=1e-5, rtol=1e-5)

    # 2) Batch not a multiple of the pack factor -> exercises padding path.
    out_odd = jax.block_until_ready(
        ini_bp_net_forward(x[:37], w_hidden, b_hidden, w_output, b_output))
    assert out_odd.shape == (37, n_output)
    assert jnp.allclose(out_odd, ref[:37], atol=1e-5, rtol=1e-5)

    # 3) bf16 MXU-operand path (x stays f32 in HBM, cast inside the kernel).
    out_bf16 = jax.block_until_ready(
        ini_bp_net_forward(x, w_hidden, b_hidden, w_output, b_output,
                           compute_dtype=jnp.bfloat16))
    assert out_bf16.shape == (batch, n_output)
    assert jnp.allclose(out_bf16, ref, atol=2e-2, rtol=2e-2)

    print("KERNEL_OK")
</pallas_src>

<mosaic_0001>
module attributes {stable_mosaic.version = 11 : i64} {
  func.func @_mlp_kernel(%arg0: i32, %arg1: memref<8x256xf32, #tpu.memory_space<vmem>>, %arg2: memref<256x512xf32, #tpu.memory_space<vmem>>, %arg3: memref<1x512xf32, #tpu.memory_space<vmem>>, %arg4: memref<512x128xf32, #tpu.memory_space<vmem>>, %arg5: memref<1x128xf32, #tpu.memory_space<vmem>>, %arg6: memref<8x128xf32, #tpu.memory_space<vmem>>) attributes {dimension_semantics = [#tpu.dimension_semantics<parallel>], iteration_bounds = array<i64: 1>, scalar_prefetch = 0 : i64, scratch_operands = 0 : i64, tpu.core_type = #tpu.core_type<tc>, window_params = [{transform_indices = @transform_0, window_bounds = array<i64: 8, 256>}, {pipeline_mode = #tpu.pipeline_mode<synchronous>, transform_indices = @transform_1, window_bounds = array<i64: 256, 512>}, {pipeline_mode = #tpu.pipeline_mode<synchronous>, transform_indices = @transform_2, window_bounds = array<i64: 1, 512>}, {pipeline_mode = #tpu.pipeline_mode<synchronous>, transform_indices = @transform_3, window_bounds = array<i64: 512, 128>}, {pipeline_mode = #tpu.pipeline_mode<synchronous>, transform_indices = @transform_4, window_bounds = array<i64: 1, 128>}, {transform_indices = @transform_5, window_bounds = array<i64: 8, 128>}]} {
    %c0 = arith.constant 0 : index
    %c0_0 = arith.constant 0 : index
    %0 = vector.load %arg1[%c0, %c0_0] : memref<8x256xf32, #tpu.memory_space<vmem>>, vector<8x256xf32>
    %c0_1 = arith.constant 0 : index
    %c0_2 = arith.constant 0 : index
    %1 = vector.load %arg2[%c0_1, %c0_2] : memref<256x512xf32, #tpu.memory_space<vmem>>, vector<256x512xf32>
    %cst = arith.constant dense<0.000000e+00> : vector<8x512xf32>
    %2 = tpu.matmul %0, %1, %cst {dimension_numbers = #tpu.dot_dimension_numbers<[1], [0], [0], [1], [0, 0, 1, 1], [], []>} : vector<8x256xf32>, vector<256x512xf32>, vector<8x512xf32> -> vector<8x512xf32>
    %c0_3 = arith.constant 0 : index
    %c0_4 = arith.constant 0 : index
    %3 = vector.load %arg3[%c0_3, %c0_4] : memref<1x512xf32, #tpu.memory_space<vmem>>, vector<1x512xf32>
    %4 = vector.broadcast %3 : vector<1x512xf32> to vector<8x512xf32>
    %5 = arith.addf %2, %4 : vector<8x512xf32>
    %cst_5 = arith.constant 5.000000e-01 : f32
    %6 = vector.broadcast %cst_5 : f32 to vector<8x512xf32>
    %7 = arith.mulf %6, %5 : vector<8x512xf32>
    %8 = math.tanh %7 : vector<8x512xf32>
    %cst_6 = arith.constant 5.000000e-01 : f32
    %9 = vector.broadcast %cst_6 : f32 to vector<8x512xf32>
    %10 = arith.mulf %9, %8 : vector<8x512xf32>
    %cst_7 = arith.constant 5.000000e-01 : f32
    %11 = vector.broadcast %cst_7 : f32 to vector<8x512xf32>
    %12 = arith.addf %10, %11 : vector<8x512xf32>
    %c0_8 = arith.constant 0 : index
    %c0_9 = arith.constant 0 : index
    %13 = vector.load %arg4[%c0_8, %c0_9] : memref<512x128xf32, #tpu.memory_space<vmem>>, vector<512x128xf32>
    %cst_10 = arith.constant dense<0.000000e+00> : vector<8x128xf32>
    %14 = tpu.matmul %12, %13, %cst_10 {dimension_numbers = #tpu.dot_dimension_numbers<[1], [0], [0], [1], [0, 0, 1, 1], [], []>} : vector<8x512xf32>, vector<512x128xf32>, vector<8x128xf32> -> vector<8x128xf32>
    %c0_11 = arith.constant 0 : index
    %c0_12 = arith.constant 0 : index
    %15 = vector.load %arg5[%c0_11, %c0_12] : memref<1x128xf32, #tpu.memory_space<vmem>>, vector<1x128xf32>
    %16 = vector.broadcast %15 : vector<1x128xf32> to vector<8x128xf32>
    %17 = arith.addf %14, %16 : vector<8x128xf32>
    %cst_13 = arith.constant 5.000000e-01 : f32
    %18 = vector.broadcast %cst_13 : f32 to vector<8x128xf32>
    %19 = arith.mulf %18, %17 : vector<8x128xf32>
    %20 = math.tanh %19 : vector<8x128xf32>
    %cst_14 = arith.constant 5.000000e-01 : f32
    %21 = vector.broadcast %cst_14 : f32 to vector<8x128xf32>
    %22 = arith.mulf %21, %20 : vector<8x128xf32>
    %cst_15 = arith.constant 5.000000e-01 : f32
    %23 = vector.broadcast %cst_15 : f32 to vector<8x128xf32>
    %24 = arith.addf %22, %23 : vector<8x128xf32>
    %c0_16 = arith.constant 0 : index
    %c0_17 = arith.constant 0 : index
    %25 = vector.load %arg6[%c0_16, %c0_17] : memref<8x128xf32, #tpu.memory_space<vmem>>, vector<8x128xf32>
    tpu.vector_store %arg6[%c0_16, %c0_17], %24 {strides = array<i32>} : memref<8x128xf32, #tpu.memory_space<vmem>>, vector<8x128xf32>,
    return
  }
  func.func @transform_0(%arg0: i32) -> (i32, i32) {
    %c0_i32 = arith.constant 0 : i32
    %c0_i32_0 = arith.constant 0 : i32
    return %arg0, %c0_i32 : i32, i32
  }
  func.func @transform_1(%arg0: i32) -> (i32, i32) {
    %c0_i32 = arith.constant 0 : i32
    %c0_i32_0 = arith.constant 0 : i32
    %c0_i32_1 = arith.constant 0 : i32
    return %c0_i32, %c0_i32_0 : i32, i32
  }
  func.func @transform_2(%arg0: i32) -> (i32, i32) {
    %c0_i32 = arith.constant 0 : i32
    %c0_i32_0 = arith.constant 0 : i32
    %c0_i32_1 = arith.constant 0 : i32
    return %c0_i32, %c0_i32_0 : i32, i32
  }
  func.func @transform_3(%arg0: i32) -> (i32, i32) {
    %c0_i32 = arith.constant 0 : i32
    %c0_i32_0 = arith.constant 0 : i32
    %c0_i32_1 = arith.constant 0 : i32
    return %c0_i32, %c0_i32_0 : i32, i32
  }
  func.func @transform_4(%arg0: i32) -> (i32, i32) {
    %c0_i32 = arith.constant 0 : i32
    %c0_i32_0 = arith.constant 0 : i32
    %c0_i32_1 = arith.constant 0 : i32
    return %c0_i32, %c0_i32_0 : i32, i32
  }
  func.func @transform_5(%arg0: i32) -> (i32, i32) {
    %c0_i32 = arith.constant 0 : i32
    %c0_i32_0 = arith.constant 0 : i32
    return %arg0, %c0_i32 : i32, i32
  }
}

</mosaic_0001>

<bundles_post_ra>
// kernel: tile.13
= control target key start
LH: loop header
LB: loop body
LE: loop exit
PB: predicated region body
PF: predicated region fallthrough
CT: control target
= control target key end

     0   :  { %s28_s0 = inlined_call_operand.vmem [shape: f32[32], index: 0, kind: input, shape index: {}]   ;;  %s29_s1 = inlined_call_operand.vmem [shape: f32[16,32], index: 1, kind: output, shape index: {}]  }
   0x1   :  { %v4_v0 = vld [vmem:[%s28_s0] ss:$0 sm:$0xff] }
   0x2   :  { %5 = vst [vmem:[%s29_s1] sm:$0xff] %v4_v0  ;;  %8 = vst [vmem:[%s29_s1 + $0x8] sm:$0xff] %v4_v0 }

// kernel: tile.14
= control target key start
LH: loop header
LB: loop body
LE: loop exit
PB: predicated region body
PF: predicated region fallthrough
CT: control target
= control target key end

     0   :  { %s57_s8 = smov 96   ;;  %vm3_vm0 = vcmask 261120   ;;  %s59_s15 = smov 64   ;;  %vm9_vm1 = vcmask 1048320   ;;  %vm15_vm2 = vcmask 785920   ;;  %vm21_vm3 = vcmask 523520   ;;  %s94_s0 = inlined_call_operand.vmem [shape: f32[16,32], index: 0, kind: input, shape index: {}]   ;;  %s95_s1 = inlined_call_operand.vmem [shape: f32[1,512], index: 1, kind: output, shape index: {}]  }
   0x1   :  { %v48_v0 = vld [vmem:[%s94_s0 + $0x3] ss:$4 sm:$0xf]   ;;  %v49_v1 = vld [vmem:[%s94_s0 + $0x2] ss:$4 sm:$0xf]  }
   0x2   :  { %7 = vrot.lane.b32.xlu0 %v48_v0, %s57_s8  ;;  %v50_v2 = vld [vmem:[%s94_s0 + $0x1] ss:$4 sm:$0xf]   ;;  %v2_v3 = vld [vmem:[%s94_s0] ss:$4 sm:$0xf]  }
   0x3   :  { %s58_s0 = smov 32   ;;  %4 = vst.msk [vmem:[#allocation0] ss:$8 sm:$0xf] %vm3_vm0, %v2_v3  }
   0x4   :  { %19 = vrot.lane.b32.xlu1 %v50_v2, %s58_s0 }
   0x6   :  { %13 = vrot.lane.b32.xlu0 %v49_v1, %s59_s15 }
  0x74   :  { %v8_v4 = vpop.permute.xlu0 %7  }
  0x75   :  { %10 = vst.msk [vmem:[#allocation0] ss:$8 sm:$0xf] %vm9_vm1, %v8_v4  }
  0x76   :  { %v20_v5 = vpop.permute.xlu1 %19  }
  0x78   :  { %v14_v6 = vpop.permute.xlu0 %13  }
  0x79   :  { %16 = vst.msk [vmem:[#allocation0] ss:$8 sm:$0xf] %vm15_vm2, %v14_v6  }
  0x7a   :  { %22 = vst.msk [vmem:[#allocation0] ss:$8 sm:$0xf] %vm21_vm3, %v20_v5  }
  0x81   :  { %v26_v7 = vld [vmem:[#allocation0] sm:$0x1]  ;;  %v30_v8 = vld [vmem:[#allocation0 + $0x8] sm:$0x1]  ;;  %v35_v9 = vld [vmem:[#allocation0 + $0x10] sm:$0x1] }
  0x82   :  { %28 = vst [vmem:[%s95_s1] sm:$0x1] %v26_v7  ;;  %51 = vst [vmem:[%s95_s1 + $0x1] sm:$0x1] %v30_v8  ;;  %v41_v10 = vld [vmem:[#allocation0 + $0x18] sm:$0x1] }
  0x83   :  { %52 = vst [vmem:[%s95_s1 + $0x2] sm:$0x1] %v35_v9  ;;  %53 = vst [vmem:[%s95_s1 + $0x3] sm:$0x1] %v41_v10 }

// kernel: tile.18
= control target key start
LH: loop header
LB: loop body
LE: loop exit
PB: predicated region body
PF: predicated region fallthrough
CT: control target
= control target key end

     0   :  { %s28_s0 = inlined_call_operand.vmem [shape: f32[8], index: 0, kind: input, shape index: {}]   ;;  %s29_s1 = inlined_call_operand.vmem [shape: f32[16,8], index: 1, kind: output, shape index: {}]  }
   0x1   :  { %v4_v0 = vld [vmem:[%s28_s0] ss:$0 sm:$0xff] }
   0x2   :  { %5 = vst [vmem:[%s29_s1] sm:$0xff] %v4_v0  ;;  %8 = vst [vmem:[%s29_s1 + $0x8] sm:$0xff] %v4_v0 }

// kernel: tile.19
= control target key start
LH: loop header
LB: loop body
LE: loop exit
PB: predicated region body
PF: predicated region fallthrough
CT: control target
= control target key end

     0   :  { %s131_s10 = smov 120   ;;  %s132_s11 = smov 104   ;;  %vm3_vm0 = vcmask 64512   ;;  %vm9_vm1 = vcmask 1048512   ;;  %vm15_vm2 = vcmask 982912   ;;  %vm21_vm3 = vcmask 917312   ;;  %s207_s0 = inlined_call_operand.vmem [shape: f32[16,8], index: 0, kind: input, shape index: {}]   ;;  %s208_s1 = inlined_call_operand.vmem [shape: f32[1,128], index: 1, kind: output, shape index: {}]  }
   0x1   :  { %v101_v0 = vld [vmem:[%s207_s0 + $0xf] sm:$0x1]   ;;  %v103_v1 = vld [vmem:[%s207_s0 + $0xd] sm:$0x1]   ;;  %v102_v2 = vld [vmem:[%s207_s0 + $0xe] sm:$0x1]  }
   0x2   :  { %7 = vrot.lane.b32.xlu0 %v101_v0, %s131_s10  ;;  %19 = vrot.lane.b32.xlu1 %v103_v1, %s132_s11  ;;  %v104_v3 = vld [vmem:[%s207_s0 + $0xc] sm:$0x1]   ;;  %s133_s16 = smov 112   ;;  %s134_s17 = smov 96   ;;  %v105_v4 = vld [vmem:[%s207_s0 + $0xb] sm:$0x1]  }
   0x3   :  { %v106_v5 = vld [vmem:[%s207_s0 + $0xa] sm:$0x1]   ;;  %v2_v6 = vld [vmem:[%s207_s0] sm:$0x1]   ;;  %s135_s24 = smov 88   ;;  %s136_s25 = smov 80  }
   0x4   :  { %4 = vst.msk [vmem:[#allocation0] sm:$0x1] %vm3_vm0, %v2_v6   ;;  %v107_v7 = vld [vmem:[%s207_s0 + $0x9] sm:$0x1]   ;;  %v108_v8 = vld [vmem:[%s207_s0 + $0x8] sm:$0x1]  }
   0x5   :  { %s137_s30 = smov 72   ;;  %s138_s2 = smov 64   ;;  %v109_v9 = vld [vmem:[%s207_s0 + $0x7] sm:$0x1]   ;;  %v110_v10 = vld [vmem:[%s207_s0 + $0x6] sm:$0x1]  }
   0x6   :  { %13 = vrot.lane.b32.xlu0 %v102_v2, %s133_s16  ;;  %25 = vrot.lane.b32.xlu1 %v104_v3, %s134_s17  ;;  %s139_s7 = smov 56   ;;  %s140_s8 = smov 48   ;;  %v111_v11 = vld [vmem:[%s207_s0 + $0x5] sm:$0x1]   ;;  %v112_v12 = vld [vmem:[%s207_s0 + $0x4] sm:$0x1]  }
   0x7   :  { %s141_s13 = smov 40   ;;  %s142_s14 = smov 32   ;;  %v113_v13 = vld [vmem:[%s207_s0 + $0x3] sm:$0x1]   ;;  %v114_v14 = vld [vmem:[%s207_s0 + $0x2] sm:$0x1]  }
   0x8   :  { %s143_s19 = smov 24   ;;  %s144_s20 = smov 16   ;;  %v115_v15 = vld [vmem:[%s207_s0 + $0x1] sm:$0x1]   ;;  %vm27_vm4 = vcmask 851712   ;;  %vm33_vm5 = vcmask 786112  }
   0x9   :  { %s145_s0 = smov 8   ;;  %vm39_vm6 = vcmask 720512   ;;  %vm45_vm7 = vcmask 654912   ;;  %vm51_vm8 = vcmask 589312   ;;  %vm57_vm9 = vcmask 523712  }
   0xa   :  { %31 = vrot.lane.b32.xlu0 %v105_v4, %s135_s24  ;;  %37 = vrot.lane.b32.xlu1 %v106_v5, %s136_s25  ;;  %vm63_vm10 = vcmask 458112   ;;  %vm69_vm11 = vcmask 392512   ;;  %vm75_vm12 = vcmask 326912   ;;  %vm81_vm13 = vcmask 261312  }
   0xb   :  { %vm87_vm14 = vcmask 195712   ;;  %vm93_vm15 = vcmask 130112  }
   0xe   :  { %43 = vrot.lane.b32.xlu0 %v107_v7, %s137_s30  ;;  %49 = vrot.lane.b32.xlu1 %v108_v8, %s138_s2 }
  0x12   :  { %55 = vrot.lane.b32.xlu0 %v109_v9, %s139_s7  ;;  %61 = vrot.lane.b32.xlu1 %v110_v10, %s140_s8 }
  0x16   :  { %67 = vrot.lane.b32.xlu0 %v111_v11, %s141_s13  ;;  %73 = vrot.lane.b32.xlu1 %v112_v12, %s142_s14 }
  0x1a   :  { %79 = vrot.lane.b32.xlu0 %v113_v13, %s143_s19  ;;  %85 = vrot.lane.b32.xlu1 %v114_v14, %s144_s20 }
  0x1e   :  { %91 = vrot.lane.b32.xlu0 %v115_v15, %s145_s0 }
  0x74   :  { %v8_v16 = vpop.permute.xlu0 %7   ;;  %v20_v17 = vpop.permute.xlu1 %19  }
  0x75   :  { %10 = vst.msk [vmem:[#allocation0] sm:$0x1] %vm9_vm1, %v8_v16  }
  0x78   :  { %v14_v18 = vpop.permute.xlu0 %13   ;;  %v26_v19 = vpop.permute.xlu1 %25  }
  0x79   :  { %16 = vst.msk [vmem:[#allocation0] sm:$0x1] %vm15_vm2, %v14_v18  }
  0x7a   :  { %22 = vst.msk [vmem:[#allocation0] sm:$0x1] %vm21_vm3, %v20_v17  }
  0x7b   :  { %28 = vst.msk [vmem:[#allocation0] sm:$0x1] %vm27_vm4, %v26_v19  }
  0x7c   :  { %v32_v20 = vpop.permute.xlu0 %31   ;;  %v38_v21 = vpop.permute.xlu1 %37  }
  0x7d   :  { %34 = vst.msk [vmem:[#allocation0] sm:$0x1] %vm33_vm5, %v32_v20  }
  0x7e   :  { %40 = vst.msk [vmem:[#allocation0] sm:$0x1] %vm39_vm6, %v38_v21  }
  0x80   :  { %v44_v22 = vpop.permute.xlu0 %43   ;;  %v50_v23 = vpop.permute.xlu1 %49  }
  0x81   :  { %46 = vst.msk [vmem:[#allocation0] sm:$0x1] %vm45_vm7, %v44_v22  }
  0x82   :  { %52 = vst.msk [vmem:[#allocation0] sm:$0x1] %vm51_vm8, %v50_v23  }
  0x84   :  { %v56_v24 = vpop.permute.xlu0 %55   ;;  %v62_v25 = vpop.permute.xlu1 %61  }
  0x85   :  { %58 = vst.msk [vmem:[#allocation0] sm:$0x1] %vm57_vm9, %v56_v24  }
  0x86   :  { %64 = vst.msk [vmem:[#allocation0] sm:$0x1] %vm63_vm10, %v62_v25  }
  0x88   :  { %v68_v26 = vpop.permute.xlu0 %67   ;;  %v74_v27 = vpop.permute.xlu1 %73  }
  0x89   :  { %70 = vst.msk [vmem:[#allocation0] sm:$0x1] %vm69_vm11, %v68_v26  }
  0x8a   :  { %76 = vst.msk [vmem:[#allocation0] sm:$0x1] %vm75_vm12, %v74_v27  }
  0x8c   :  { %v80_v28 = vpop.permute.xlu0 %79   ;;  %v86_v29 = vpop.permute.xlu1 %85  }
  0x8d   :  { %82 = vst.msk [vmem:[#allocation0] sm:$0x1] %vm81_vm13, %v80_v28  }
  0x8e   :  { %88 = vst.msk [vmem:[#allocation0] sm:$0x1] %vm87_vm14, %v86_v29  }
  0x90   :  { %v92_v30 = vpop.permute.xlu0 %91  }
  0x91   :  { %94 = vst.msk [vmem:[#allocation0] sm:$0x1] %vm93_vm15, %v92_v30  }
  0x98   :  { %v98_v31 = vld [vmem:[#allocation0] sm:$0x1] }
  0x99   :  { %100 = vst [vmem:[%s208_s1] sm:$0x1] %v98_v31 }

// kernel: ini_bp_net_forward.1
= control target key start
LH: loop header
LB: loop body
LE: loop exit
PB: predicated region body
PF: predicated region fallthrough
CT: control target
= control target key end

     0   :  { %s1444_s1 = inlined_call_operand.vmem [shape: f32[256,512], index: 1, kind: input, shape index: {}]   ;;  %s1445_s0 = inlined_call_operand.vmem [shape: f32[8,256], index: 0, kind: input, shape index: {}]   ;;  %s1446_s3 = inlined_call_operand.vmem [shape: f32[512,128], index: 3, kind: input, shape index: {}]   ;;  %s1447_s2 = inlined_call_operand.vmem [shape: f32[1,512], index: 2, kind: input, shape index: {}]   ;;  %s1448_s4 = inlined_call_operand.vmem [shape: f32[1,128], index: 4, kind: input, shape index: {}]   ;;  %s1449_s5 = inlined_call_operand.vmem [shape: f32[8,128], index: 5, kind: output, shape index: {}]  }
   0x1   :  { %v23_v0 = vld [vmem:[%s1444_s1 + $0x8] sm:$0xff]  ;;  %v25_v2 = vld [vmem:[%s1444_s1 + $0x18] sm:$0xff]  ;;  %v22_v5 = vld [vmem:[%s1444_s1] sm:$0xff] }
   0x2   :  { %v27_v1 = vld [vmem:[%s1444_s1 + $0x28] sm:$0xff]  ;;  %v29_v4 = vld [vmem:[%s1444_s1 + $0x38] sm:$0xff]  ;;  %v26_v6 = vld [vmem:[%s1444_s1 + $0x20] sm:$0xff] }
   0x3   :  { %v621_v3 = vpack.c.bf16 %v27_v1, %v23_v0  ;;  %v685_v7 = vpack.c.bf16 %v29_v4, %v25_v2  ;;  %v623_v8 = vpack.c.bf16 %v26_v6, %v22_v5  ;;  %v24_v9 = vld [vmem:[%s1444_s1 + $0x10] sm:$0xff]  ;;  %v31_v11 = vld [vmem:[%s1444_s1 + $0x48] sm:$0xff]  ;;  %v33_v14 = vld [vmem:[%s1444_s1 + $0x58] sm:$0xff] }
   0x4   :  { %v28_v10 = vld [vmem:[%s1444_s1 + $0x30] sm:$0xff]  ;;  %v35_v13 = vld [vmem:[%s1444_s1 + $0x68] sm:$0xff]  ;;  %v37_v15 = vld [vmem:[%s1444_s1 + $0x78] sm:$0xff] }
   0x5   :  { %622 = vmatprep.subr.bf16.mxu0 %v621_v3  ;;  %v687_v12 = vpack.c.bf16 %v28_v10, %v24_v9  ;;  %686 = vmatprep.subr.bf16.mxu1 %v685_v7  ;;  %v625_v16 = vpack.c.bf16 %v35_v13, %v31_v11  ;;  %v689_v17 = vpack.c.bf16 %v37_v15, %v33_v14  ;;  %v30_v18 = vld [vmem:[%s1444_s1 + $0x40] sm:$0xff]  ;;  %v32_v20 = vld [vmem:[%s1444_s1 + $0x50] sm:$0xff]  ;;  %v39_v23 = vld [vmem:[%s1444_s1 + $0x88] sm:$0xff] }
   0x6   :  { %624 = vmatpush1.bf16.msra.mxu0 %v623_v8  ;;  %v34_v19 = vld [vmem:[%s1444_s1 + $0x60] sm:$0xff]  ;;  %v36_v22 = vld [vmem:[%s1444_s1 + $0x70] sm:$0xff]  ;;  %v43_v24 = vld [vmem:[%s1444_s1 + $0xa8] sm:$0xff] }
   0x7   :  { %688 = vmatpush1.bf16.msra.mxu1 %v687_v12  ;;  %v627_v21 = vpack.c.bf16 %v34_v19, %v30_v18  ;;  %626 = vmatprep.subr.bf16.mxu0 %v625_v16  ;;  %v691_v25 = vpack.c.bf16 %v36_v22, %v32_v20  ;;  %v629_v26 = vpack.c.bf16 %v43_v24, %v39_v23  ;;  %v41_v27 = vld [vmem:[%s1444_s1 + $0x98] sm:$0xff]  ;;  %v38_v29 = vld [vmem:[%s1444_s1 + $0x80] sm:$0xff]  ;;  %v40_v32 = vld [vmem:[%s1444_s1 + $0x90] sm:$0xff] }
   0x8   :  { %690 = vmatprep.subr.bf16.mxu1 %v689_v17  ;;  %v45_v28 = vld [vmem:[%s1444_s1 + $0xb8] sm:$0xff]  ;;  %v42_v31 = vld [vmem:[%s1444_s1 + $0xa0] sm:$0xff]  ;;  %v44_v33 = vld [vmem:[%s1444_s1 + $0xb0] sm:$0xff] }
   0x9   :  { %v693_v30 = vpack.c.bf16 %v45_v28, %v41_v27  ;;  %v631_v34 = vpack.c.bf16 %v42_v31, %v38_v29  ;;  %v47_v35 = vld [vmem:[%s1444_s1 + $0xc8] sm:$0xff]  ;;  %v49_v37 = vld [vmem:[%s1444_s1 + $0xd8] sm:$0xff]  ;;  %v695_v38 = vpack.c.bf16 %v44_v33, %v40_v32  ;;  %v46_v41 = vld [vmem:[%s1444_s1 + $0xc0] sm:$0xff] }
   0xa   :  { %628 = vmatpush1.bf16.msra.mxu0 %v627_v21  ;;  %v51_v36 = vld [vmem:[%s1444_s1 + $0xe8] sm:$0xff]  ;;  %v53_v40 = vld [vmem:[%s1444_s1 + $0xf8] sm:$0xff]  ;;  %v50_v42 = vld [vmem:[%s1444_s1 + $0xe0] sm:$0xff] }
   0xb   :  { %692 = vmatpush1.bf16.msra.mxu1 %v691_v25  ;;  %630 = vmatprep.subr.bf16.mxu0 %v629_v26  ;;  %v633_v39 = vpack.c.bf16 %v51_v36, %v47_v35  ;;  %v697_v43 = vpack.c.bf16 %v53_v40, %v49_v37  ;;  %v48_v44 = vld [vmem:[%s1444_s1 + $0xd0] sm:$0xff]  ;;  %v55_v46 = vld [vmem:[%s1444_s1 + $0x108] sm:$0xff]  ;;  %v57_v48 = vld [vmem:[%s1444_s1 + $0x118] sm:$0xff]  ;;  %v635_v50 = vpack.c.bf16 %v50_v42, %v46_v41 }
   0xc   :  { %694 = vmatprep.subr.bf16.mxu1 %v693_v30  ;;  %v52_v45 = vld [vmem:[%s1444_s1 + $0xf0] sm:$0xff]  ;;  %v59_v47 = vld [vmem:[%s1444_s1 + $0x128] sm:$0xff]  ;;  %v61_v49 = vld [vmem:[%s1444_s1 + $0x138] sm:$0xff] }
   0xd   :  { %v699_v51 = vpack.c.bf16 %v52_v45, %v48_v44  ;;  %v637_v52 = vpack.c.bf16 %v59_v47, %v55_v46  ;;  %v54_v53 = vld [vmem:[%s1444_s1 + $0x100] sm:$0xff]  ;;  %v56_v55 = vld [vmem:[%s1444_s1 + $0x110] sm:$0xff]  ;;  %v701_v56 = vpack.c.bf16 %v61_v49, %v57_v48  ;;  %v63_v58 = vld [vmem:[%s1444_s1 + $0x148] sm:$0xff] }
   0xe   :  { %632 = vmatpush1.bf16.msra.mxu0 %v631_v34  ;;  %v58_v54 = vld [vmem:[%s1444_s1 + $0x120] sm:$0xff]  ;;  %v60_v57 = vld [vmem:[%s1444_s1 + $0x130] sm:$0xff]  ;;  %v67_v59 = vld [vmem:[%s1444_s1 + $0x168] sm:$0xff] }
   0xf   :  { %696 = vmatpush1.bf16.msra.mxu1 %v695_v38  ;;  %634 = vmatprep.subr.bf16.mxu0 %v633_v39  ;;  %v65_v60 = vld [vmem:[%s1444_s1 + $0x158] sm:$0xff]  ;;  %v639_v62 = vpack.c.bf16 %v58_v54, %v54_v53  ;;  %v703_v63 = vpack.c.bf16 %v60_v57, %v56_v55  ;;  %v641_v0 = vpack.c.bf16 %v67_v59, %v63_v58  ;;  %v62_v1 = vld [vmem:[%s1444_s1 + $0x140] sm:$0xff]  ;;  %v64_v3 = vld [vmem:[%s1444_s1 + $0x150] sm:$0xff] }
  0x10   :  { %698 = vmatprep.subr.bf16.mxu1 %v697_v43  ;;  %v69_v61 = vld [vmem:[%s1444_s1 + $0x178] sm:$0xff]  ;;  %v66_v2 = vld [vmem:[%s1444_s1 + $0x160] sm:$0xff]  ;;  %v68_v5 = vld [vmem:[%s1444_s1 + $0x170] sm:$0xff] }
  0x11   :  { %v705_v4 = vpack.c.bf16 %v69_v61, %v65_v60  ;;  %v71_v6 = vld [vmem:[%s1444_s1 + $0x188] sm:$0xff]  ;;  %v73_v8 = vld [vmem:[%s1444_s1 + $0x198] sm:$0xff]  ;;  %v643_v10 = vpack.c.bf16 %v66_v2, %v62_v1  ;;  %v707_v11 = vpack.c.bf16 %v68_v5, %v64_v3  ;;  %v70_v13 = vld [vmem:[%s1444_s1 + $0x180] sm:$0xff] }
  0x12   :  { %636 = vmatpush1.bf16.msra.mxu0 %v635_v50  ;;  %v75_v7 = vld [vmem:[%s1444_s1 + $0x1a8] sm:$0xff]  ;;  %v77_v9 = vld [vmem:[%s1444_s1 + $0x1b8] sm:$0xff]  ;;  %v74_v14 = vld [vmem:[%s1444_s1 + $0x1a0] sm:$0xff] }
  0x13   :  { %700 = vmatpush1.bf16.msra.mxu1 %v699_v51  ;;  %638 = vmatprep.subr.bf16.mxu0 %v637_v52  ;;  %v645_v12 = vpack.c.bf16 %v75_v7, %v71_v6  ;;  %v72_v15 = vld [vmem:[%s1444_s1 + $0x190] sm:$0xff]  ;;  %v709_v16 = vpack.c.bf16 %v77_v9, %v73_v8  ;;  %v79_v18 = vld [vmem:[%s1444_s1 + $0x1c8] sm:$0xff]  ;;  %v81_v20 = vld [vmem:[%s1444_s1 + $0x1d8] sm:$0xff]  ;;  %v647_v22 = vpack.c.bf16 %v74_v14, %v70_v13 }
  0x14   :  { %702 = vmatprep.subr.bf16.mxu1 %v701_v56  ;;  %v76_v17 = vld [vmem:[%s1444_s1 + $0x1b0] sm:$0xff]  ;;  %v83_v19 = vld [vmem:[%s1444_s1 + $0x1e8] sm:$0xff]  ;;  %v85_v21 = vld [vmem:[%s1444_s1 + $0x1f8] sm:$0xff] }
  0x15   :  { %v711_v23 = vpack.c.bf16 %v76_v17, %v72_v15  ;;  %v649_v24 = vpack.c.bf16 %v83_v19, %v79_v18  ;;  %v78_v25 = vld [vmem:[%s1444_s1 + $0x1c0] sm:$0xff]  ;;  %v80_v27 = vld [vmem:[%s1444_s1 + $0x1d0] sm:$0xff]  ;;  %v713_v28 = vpack.c.bf16 %v85_v21, %v81_v20  ;;  %v87_v30 = vld [vmem:[%s1444_s1 + $0x208] sm:$0xff] }
  0x16   :  { %640 = vmatpush1.bf16.msra.mxu0 %v639_v62  ;;  %v82_v26 = vld [vmem:[%s1444_s1 + $0x1e0] sm:$0xff]  ;;  %v84_v29 = vld [vmem:[%s1444_s1 + $0x1f0] sm:$0xff]  ;;  %v91_v31 = vld [vmem:[%s1444_s1 + $0x228] sm:$0xff] }
  0x17   :  { %704 = vmatpush1.bf16.msra.mxu1 %v703_v63  ;;  %642 = vmatprep.subr.bf16.mxu0 %v641_v0  ;;  %v89_v32 = vld [vmem:[%s1444_s1 + $0x218] sm:$0xff]  ;;  %v651_v34 = vpack.c.bf16 %v82_v26, %v78_v25  ;;  %v715_v35 = vpack.c.bf16 %v84_v29, %v80_v27  ;;  %v653_v36 = vpack.c.bf16 %v91_v31, %v87_v30  ;;  %v86_v37 = vld [vmem:[%s1444_s1 + $0x200] sm:$0xff]  ;;  %v88_v39 = vld [vmem:[%s1444_s1 + $0x210] sm:$0xff] }
  0x18   :  { %706 = vmatprep.subr.bf16.mxu1 %v705_v4  ;;  %v93_v33 = vld [vmem:[%s1444_s1 + $0x238] sm:$0xff]  ;;  %v90_v38 = vld [vmem:[%s1444_s1 + $0x220] sm:$0xff]  ;;  %v92_v41 = vld [vmem:[%s1444_s1 + $0x230] sm:$0xff] }
  0x19   :  { %v717_v40 = vpack.c.bf16 %v93_v33, %v89_v32  ;;  %v95_v42 = vld [vmem:[%s1444_s1 + $0x248] sm:$0xff]  ;;  %v97_v44 = vld [vmem:[%s1444_s1 + $0x258] sm:$0xff]  ;;  %v655_v46 = vpack.c.bf16 %v90_v38, %v86_v37  ;;  %v719_v47 = vpack.c.bf16 %v92_v41, %v88_v39  ;;  %v94_v49 = vld [vmem:[%s1444_s1 + $0x240] sm:$0xff] }
  0x1a   :  { %644 = vmatpush1.bf16.msra.mxu0 %v643_v10  ;;  %v99_v43 = vld [vmem:[%s1444_s1 + $0x268] sm:$0xff]  ;;  %v101_v45 = vld [vmem:[%s1444_s1 + $0x278] sm:$0xff]  ;;  %v98_v50 = vld [vmem:[%s1444_s1 + $0x260] sm:$0xff] }
  0x1b   :  { %708 = vmatpush1.bf16.msra.mxu1 %v707_v11  ;;  %646 = vmatprep.subr.bf16.mxu0 %v645_v12  ;;  %v657_v48 = vpack.c.bf16 %v99_v43, %v95_v42  ;;  %v96_v51 = vld [vmem:[%s1444_s1 + $0x250] sm:$0xff]  ;;  %v721_v52 = vpack.c.bf16 %v101_v45, %v97_v44  ;;  %v103_v54 = vld [vmem:[%s1444_s1 + $0x288] sm:$0xff]  ;;  %v105_v56 = vld [vmem:[%s1444_s1 + $0x298] sm:$0xff]  ;;  %v659_v58 = vpack.c.bf16 %v98_v50, %v94_v49 }
  0x1c   :  { %710 = vmatprep.subr.bf16.mxu1 %v709_v16  ;;  %v100_v53 = vld [vmem:[%s1444_s1 + $0x270] sm:$0xff]  ;;  %v107_v55 = vld [vmem:[%s1444_s1 + $0x2a8] sm:$0xff]  ;;  %v109_v57 = vld [vmem:[%s1444_s1 + $0x2b8] sm:$0xff] }
  0x1d   :  { %v723_v59 = vpack.c.bf16 %v100_v53, %v96_v51  ;;  %v661_v60 = vpack.c.bf16 %v107_v55, %v103_v54  ;;  %v102_v61 = vld [vmem:[%s1444_s1 + $0x280] sm:$0xff]  ;;  %v104_v63 = vld [vmem:[%s1444_s1 + $0x290] sm:$0xff]  ;;  %v725_v0 = vpack.c.bf16 %v109_v57, %v105_v56  ;;  %v111_v2 = vld [vmem:[%s1444_s1 + $0x2c8] sm:$0xff] }
  0x1e   :  { %648 = vmatpush1.bf16.msra.mxu0 %v647_v22  ;;  %v106_v62 = vld [vmem:[%s1444_s1 + $0x2a0] sm:$0xff]  ;;  %v108_v1 = vld [vmem:[%s1444_s1 + $0x2b0] sm:$0xff]  ;;  %v115_v3 = vld [vmem:[%s1444_s1 + $0x2e8] sm:$0xff] }
  0x1f   :  { %712 = vmatpush1.bf16.msra.mxu1 %v711_v23  ;;  %650 = vmatprep.subr.bf16.mxu0 %v649_v24  ;;  %v113_v4 = vld [vmem:[%s1444_s1 + $0x2d8] sm:$0xff]  ;;  %v663_v6 = vpack.c.bf16 %v106_v62, %v102_v61  ;;  %v110_v7 = vld [vmem:[%s1444_s1 + $0x2c0] sm:$0xff]  ;;  %v727_v8 = vpack.c.bf16 %v108_v1, %v104_v63  ;;  %v665_v9 = vpack.c.bf16 %v115_v3, %v111_v2  ;;  %v112_v11 = vld [vmem:[%s1444_s1 + $0x2d0] sm:$0xff] }
  0x20   :  { %714 = vmatprep.subr.bf16.mxu1 %v713_v28  ;;  %v117_v5 = vld [vmem:[%s1444_s1 + $0x2f8] sm:$0xff]  ;;  %v114_v10 = vld [vmem:[%s1444_s1 + $0x2e0] sm:$0xff]  ;;  %v116_v12 = vld [vmem:[%s1444_s1 + $0x2f0] sm:$0xff] }
  0x21   :  { %v729_v13 = vpack.c.bf16 %v117_v5, %v113_v4  ;;  %v119_v14 = vld [vmem:[%s1444_s1 + $0x308] sm:$0xff]  ;;  %v121_v17 = vld [vmem:[%s1444_s1 + $0x318] sm:$0xff]  ;;  %v667_v19 = vpack.c.bf16 %v114_v10, %v110_v7  ;;  %v731_v20 = vpack.c.bf16 %v116_v12, %v112_v11  ;;  %v118_v22 = vld [vmem:[%s1444_s1 + $0x300] sm:$0xff] }
  0x22   :  { %652 = vmatpush1.bf16.msra.mxu0 %v651_v34  ;;  %v123_v15 = vld [vmem:[%s1444_s1 + $0x328] sm:$0xff]  ;;  %v125_v18 = vld [vmem:[%s1444_s1 + $0x338] sm:$0xff]  ;;  %v122_v23 = vld [vmem:[%s1444_s1 + $0x320] sm:$0xff] }
  0x23   :  { %716 = vmatpush1.bf16.msra.mxu1 %v715_v35  ;;  %654 = vmatprep.subr.bf16.mxu0 %v653_v36  ;;  %v21_v16 = vld [vmem:[%s1445_s0 + $0x8] sm:$0xff]  ;;  %v669_v21 = vpack.c.bf16 %v123_v15, %v119_v14  ;;  %v120_v24 = vld [vmem:[%s1444_s1 + $0x310] sm:$0xff]  ;;  %v733_v25 = vpack.c.bf16 %v125_v18, %v121_v17  ;;  %v129_v29 = vld [vmem:[%s1444_s1 + $0x358] sm:$0xff]  ;;  %v671_v31 = vpack.c.bf16 %v122_v23, %v118_v22 }
  0x24   :  { %718 = vmatprep.subr.bf16.mxu1 %v717_v40  ;;  %236 = vmatprep.mubr.f32.mxu0 %v21_v16  ;;  %v124_v26 = vld [vmem:[%s1444_s1 + $0x330] sm:$0xff]  ;;  %v127_v27 = vld [vmem:[%s1444_s1 + $0x348] sm:$0xff]  ;;  %v133_v30 = vld [vmem:[%s1444_s1 + $0x378] sm:$0xff] }
  0x25   :  { %307 = vmatprep.mubr.f32.mxu1 %v21_v16  ;;  %v131_v28 = vld [vmem:[%s1444_s1 + $0x368] sm:$0xff]  ;;  %v735_v32 = vpack.c.bf16 %v124_v26, %v120_v24  ;;  %v126_v34 = vld [vmem:[%s1444_s1 + $0x340] sm:$0xff]  ;;  %v128_v36 = vld [vmem:[%s1444_s1 + $0x350] sm:$0xff]  ;;  %v737_v37 = vpack.c.bf16 %v133_v30, %v129_v29 }
  0x26   :  { %656 = vmatpush1.bf16.msra.mxu0 %v655_v46  ;;  %v673_v33 = vpack.c.bf16 %v131_v28, %v127_v27  ;;  %v130_v35 = vld [vmem:[%s1444_s1 + $0x360] sm:$0xff]  ;;  %v132_v38 = vld [vmem:[%s1444_s1 + $0x370] sm:$0xff]  ;;  %v135_v39 = vld [vmem:[%s1444_s1 + $0x388] sm:$0xff] }
  0x27   :  { %720 = vmatpush1.bf16.msra.mxu1 %v719_v47  ;;  %658 = vmatprep.subr.bf16.mxu0 %v657_v48  ;;  %v139_v40 = vld [vmem:[%s1444_s1 + $0x3a8] sm:$0xff]  ;;  %v137_v41 = vld [vmem:[%s1444_s1 + $0x398] sm:$0xff]  ;;  %v675_v43 = vpack.c.bf16 %v130_v35, %v126_v34  ;;  %v739_v44 = vpack.c.bf16 %v132_v38, %v128_v36  ;;  %v134_v46 = vld [vmem:[%s1444_s1 + $0x380] sm:$0xff] }
  0x28   :  { %722 = vmatprep.subr.bf16.mxu1 %v721_v52  ;;  %v141_v42 = vld [vmem:[%s1444_s1 + $0x3b8] sm:$0xff]  ;;  %v677_v45 = vpack.c.bf16 %v139_v40, %v135_v39  ;;  %v138_v47 = vld [vmem:[%s1444_s1 + $0x3a0] sm:$0xff]  ;;  %v136_v48 = vld [vmem:[%s1444_s1 + $0x390] sm:$0xff] }
  0x29   :  { %v741_v49 = vpack.c.bf16 %v141_v42, %v137_v41  ;;  %v140_v50 = vld [vmem:[%s1444_s1 + $0x3b0] sm:$0xff]  ;;  %v143_v51 = vld [vmem:[%s1444_s1 + $0x3c8] sm:$0xff]  ;;  %v145_v53 = vld [vmem:[%s1444_s1 + $0x3d8] sm:$0xff]  ;;  %v679_v55 = vpack.c.bf16 %v138_v47, %v134_v46 }
  0x2a   :  { %660 = vmatpush1.bf16.msra.mxu0 %v659_v58  ;;  %v147_v52 = vld [vmem:[%s1444_s1 + $0x3e8] sm:$0xff]  ;;  %v149_v54 = vld [vmem:[%s1444_s1 + $0x3f8] sm:$0xff]  ;;  %v743_v56 = vpack.c.bf16 %v140_v50, %v136_v48  ;;  %v142_v58 = vld [vmem:[%s1444_s1 + $0x3c0] sm:$0xff] }
  0x2b   :  { %724 = vmatpush1.bf16.msra.mxu1 %v723_v59  ;;  %662 = vmatprep.subr.bf16.mxu0 %v661_v60  ;;  %v681_v57 = vpack.c.bf16 %v147_v52, %v143_v51  ;;  %v146_v59 = vld [vmem:[%s1444_s1 + $0x3e0] sm:$0xff]  ;;  %v144_v60 = vld [vmem:[%s1444_s1 + $0x3d0] sm:$0xff]  ;;  %v745_v61 = vpack.c.bf16 %v149_v54, %v145_v53  ;;  %v379_v2 = vld [vmem:[%s1446_s3 + $0x188] sm:$0xff] }
  0x2c   :  { %726 = vmatprep.subr.bf16.mxu1 %v725_v0  ;;  %v148_v62 = vld [vmem:[%s1444_s1 + $0x3f0] sm:$0xff]  ;;  %v346_v63 = vld [vmem:[%s1446_s3 + $0x80] sm:$0xff]  ;;  %v347_v0 = vld [vmem:[%s1446_s3 + $0x88] sm:$0xff]  ;;  %v683_v3 = vpack.c.bf16 %v146_v59, %v142_v58 }
  0x2d   :  { %v378_v1 = vld [vmem:[%s1446_s3 + $0x180] sm:$0xff]  ;;  %v747_v4 = vpack.c.bf16 %v148_v62, %v144_v60  ;;  %v749_v5 = vpack.c.bf16 %v347_v0, %v346_v63  ;;  %v331_v7 = vld [vmem:[%s1446_s3 + $0x8] sm:$0xff]  ;;  %v348_v11 = vld [vmem:[%s1446_s3 + $0x90] sm:$0xff] }
  0x2e   :  { %664 = vmatpush1.bf16.msra.mxu0 %v663_v6  ;;  %v330_v6 = vld [vmem:[%s1446_s3] sm:$0xff]  ;;  %v363_v10 = vld [vmem:[%s1446_s3 + $0x108] sm:$0xff]  ;;  %v349_v12 = vld [vmem:[%s1446_s3 + $0x98] sm:$0xff] }
  0x2f   :  { %728 = vmatpush1.bf16.msra.mxu1 %v727_v8  ;;  %666 = vmatprep.subr.bf16.mxu0 %v665_v9  ;;  %v362_v8 = vld [vmem:[%s1446_s3 + $0x100] sm:$0xff]  ;;  %v781_v9 = vpack.c.bf16 %v379_v2, %v378_v1  ;;  %v381_v14 = vld [vmem:[%s1446_s3 + $0x198] sm:$0xff]  ;;  %v751_v16 = vpack.c.bf16 %v331_v7, %v330_v6  ;;  %v753_v18 = vpack.c.bf16 %v349_v12, %v348_v11  ;;  %v383_v27 = vld [vmem:[%s1446_s3 + $0x1a8] sm:$0xff] }
  0x30   :  { %730 = vmatprep.subr.bf16.mxu1 %v729_v13  ;;  %v380_v13 = vld [vmem:[%s1446_s3 + $0x190] sm:$0xff]  ;;  %v20_v15 = vld [vmem:[%s1445_s0] sm:$0xff]  ;;  %v783_v17 = vpack.c.bf16 %v363_v10, %v362_v8  ;;  %v365_v23 = vld [vmem:[%s1446_s3 + $0x118] sm:$0xff] }
  0x31   :  { %v785_v22 = vpack.c.bf16 %v381_v14, %v380_v13  ;;  %v350_v24 = vld [vmem:[%s1446_s3 + $0xa0] sm:$0xff]  ;;  %v367_v35 = vld [vmem:[%s1446_s3 + $0x128] sm:$0xff]  ;;  %v352_v38 = vld [vmem:[%s1446_s3 + $0xb0] sm:$0xff] }
  0x32   :  { %668 = vmatpush1.bf16.msra.mxu0 %v667_v19  ;;  %v332_v19 = vld [vmem:[%s1446_s3 + $0x10] sm:$0xff]  ;;  %v382_v26 = vld [vmem:[%s1446_s3 + $0x1a0] sm:$0xff]  ;;  %v353_v39 = vld [vmem:[%s1446_s3 + $0xb8] sm:$0xff] }
  0x33   :  { %732 = vmatpush1.bf16.msra.mxu1 %v731_v20  ;;  %670 = vmatprep.subr.bf16.mxu0 %v669_v21  ;;  %v333_v20 = vld [vmem:[%s1446_s3 + $0x18] sm:$0xff]  ;;  %v364_v21 = vld [vmem:[%s1446_s3 + $0x110] sm:$0xff]  ;;  %v366_v34 = vld [vmem:[%s1446_s3 + $0x120] sm:$0xff]  ;;  %v761_v41 = vpack.c.bf16 %v353_v39, %v352_v38 }
  0x34   :  { %734 = vmatprep.subr.bf16.mxu1 %v733_v25  ;;  %v351_v25 = vld [vmem:[%s1446_s3 + $0xa8] sm:$0xff]  ;;  %v755_v28 = vpack.c.bf16 %v333_v20, %v332_v19  ;;  %v787_v29 = vpack.c.bf16 %v365_v23, %v364_v21  ;;  %v384_v40 = vld [vmem:[%s1446_s3 + $0x1b0] sm:$0xff]  ;;  %v385_v42 = vld [vmem:[%s1446_s3 + $0x1b8] sm:$0xff] }
  0x35   :  { %v757_v30 = vpack.c.bf16 %v351_v25, %v350_v24  ;;  %v368_v47 = vld [vmem:[%s1446_s3 + $0x130] sm:$0xff]  ;;  %v369_v48 = vld [vmem:[%s1446_s3 + $0x138] sm:$0xff]  ;;  %v354_v50 = vld [vmem:[%s1446_s3 + $0xc0] sm:$0xff] }
  0x36   :  { %672 = vmatpush1.bf16.msra.mxu0 %v671_v31  ;;  %v334_v31 = vld [vmem:[%s1446_s3 + $0x20] sm:$0xff]  ;;  %v355_v51 = vld [vmem:[%s1446_s3 + $0xc8] sm:$0xff]  ;;  %v356_v62 = vld [vmem:[%s1446_s3 + $0xd0] sm:$0xff] }
  0x37   :  { %736 = vmatpush1.bf16.msra.mxu1 %v735_v32  ;;  %674 = vmatprep.subr.bf16.mxu0 %v673_v33  ;;  %v335_v32 = vld [vmem:[%s1446_s3 + $0x28] sm:$0xff]  ;;  %v789_v33 = vpack.c.bf16 %v383_v27, %v382_v26  ;;  %v386_v52 = vld [vmem:[%s1446_s3 + $0x1c0] sm:$0xff]  ;;  %v765_v53 = vpack.c.bf16 %v355_v51, %v354_v50  ;;  %v357_v63 = vld [vmem:[%s1446_s3 + $0xd8] sm:$0xff] }
  0x38   :  { %738 = vmatprep.subr.bf16.mxu1 %v737_v37  ;;  %v759_v36 = vpack.c.bf16 %v335_v32, %v334_v31  ;;  %v791_v37 = vpack.c.bf16 %v367_v35, %v366_v34  ;;  %v387_v54 = vld [vmem:[%s1446_s3 + $0x1c8] sm:$0xff]  ;;  %v370_v59 = vld [vmem:[%s1446_s3 + $0x140] sm:$0xff]  ;;  %v388_v0 = vld [vmem:[%s1446_s3 + $0x1d0] sm:$0xff]  ;;  %v769_v1 = vpack.c.bf16 %v357_v63, %v356_v62  ;;  %v152_v34 = vlaneseq }
  0x39   :  { %v371_v60 = vld [vmem:[%s1446_s3 + $0x148] sm:$0xff]  ;;  %v389_v2 = vld [vmem:[%s1446_s3 + $0x1d8] sm:$0xff]  ;;  %v372_v7 = vld [vmem:[%s1446_s3 + $0x150] sm:$0xff] }
  0x3a   :  { %676 = vmatpush1.bf16.msra.mxu0 %v675_v43  ;;  %v336_v43 = vld [vmem:[%s1446_s3 + $0x30] sm:$0xff]  ;;  %v373_v8 = vld [vmem:[%s1446_s3 + $0x158] sm:$0xff]  ;;  %v358_v10 = vld [vmem:[%s1446_s3 + $0xe0] sm:$0xff]  ;;  %v153_v35 = vshrl.u32 %v152_v34, 7 }
  0x3b   :  { %740 = vmatpush1.bf16.msra.mxu1 %v739_v44  ;;  %678 = vmatprep.subr.bf16.mxu0 %v677_v45  ;;  %v337_v44 = vld [vmem:[%s1446_s3 + $0x38] sm:$0xff]  ;;  %v793_v45 = vpack.c.bf16 %v385_v42, %v384_v40  ;;  %v359_v11 = vld [vmem:[%s1446_s3 + $0xe8] sm:$0xff]  ;;  %v390_v12 = vld [vmem:[%s1446_s3 + $0x1e0] sm:$0xff] }
  0x3c   :  { %742 = vmatprep.subr.bf16.mxu1 %v741_v49  ;;  %v763_v46 = vpack.c.bf16 %v337_v44, %v336_v43  ;;  %v795_v49 = vpack.c.bf16 %v369_v48, %v368_v47  ;;  %v773_v13 = vpack.c.bf16 %v359_v11, %v358_v10  ;;  %v391_v14 = vld [vmem:[%s1446_s3 + $0x1e8] sm:$0xff]  ;;  %v374_v19 = vld [vmem:[%s1446_s3 + $0x160] sm:$0xff]  ;;  %v361_v23 = vld [vmem:[%s1446_s3 + $0xf8] sm:$0xff]  ;;  %v162_v38 = vsub.s32 2, %v153_v35 }
  0x3d   :  { %v375_v20 = vld [vmem:[%s1446_s3 + $0x168] sm:$0xff]  ;;  %v392_v24 = vld [vmem:[%s1446_s3 + $0x1f0] sm:$0xff]  ;;  %v393_v26 = vld [vmem:[%s1446_s3 + $0x1f8] sm:$0xff]  ;;  %v158_v39 = vsub.s32 1, %v153_v35  ;;  %v166_v40 = vsub.s32 3, %v153_v35 }
  0x3e   :  { %680 = vmatpush1.bf16.msra.mxu0 %v679_v55  ;;  %v338_v55 = vld [vmem:[%s1446_s3 + $0x40] sm:$0xff]  ;;  %v807_v21 = vpack.c.bf16 %v375_v20, %v374_v19  ;;  %v344_v27 = vld [vmem:[%s1446_s3 + $0x70] sm:$0xff]  ;;  %v377_v32 = vld [vmem:[%s1446_s3 + $0x178] sm:$0xff] }
  0x3f   :  { %744 = vmatpush1.bf16.msra.mxu1 %v743_v56  ;;  %682 = vmatprep.subr.bf16.mxu0 %v681_v57  ;;  %v339_v56 = vld [vmem:[%s1446_s3 + $0x48] sm:$0xff]  ;;  %v797_v57 = vpack.c.bf16 %v387_v54, %v386_v52  ;;  %v376_v31 = vld [vmem:[%s1446_s3 + $0x170] sm:$0xff] }
  0x40   :  { %746 = vmatprep.subr.bf16.mxu1 %v745_v61  ;;  %v767_v58 = vpack.c.bf16 %v339_v56, %v338_v55  ;;  %v799_v61 = vpack.c.bf16 %v371_v60, %v370_v59 }
  0x42   :  { %684 = vmatpush1.bf16.msra.mxu0 %v683_v3  ;;  %v340_v3 = vld [vmem:[%s1446_s3 + $0x50] sm:$0xff] }
  0x43   :  { %748 = vmatpush1.bf16.msra.mxu1 %v747_v4  ;;  %750 = vmatprep.subr.bf16.mxu0 %v749_v5  ;;  %v341_v4 = vld [vmem:[%s1446_s3 + $0x58] sm:$0xff]  ;;  %v801_v5 = vpack.c.bf16 %v389_v2, %v388_v0 }
  0x44   :  { %782 = vmatprep.subr.bf16.mxu1 %v781_v9  ;;  %v771_v6 = vpack.c.bf16 %v341_v4, %v340_v3  ;;  %v803_v9 = vpack.c.bf16 %v373_v8, %v372_v7  ;;  %v550_v7 = vld [vmem:[%s1448_s4] ss:$0 sm:$0xff] }
  0x45   :  { %237 = vmatmul.mubr.f32.vlgmr.msra.gmra.mrb[0].mxu0 %v20_v15 }
  0x46   :  { %308 = vmatmul.mubr.f32.vlgmr.msra.gmra.mrb[0].mxu1 %v20_v15  ;;  %752 = vmatpush3.bf16.msra.mxu0 %v751_v16  ;;  %v342_v15 = vld [vmem:[%s1446_s3 + $0x60] sm:$0xff]  ;;  %v343_v16 = vld [vmem:[%s1446_s3 + $0x68] sm:$0xff] }
  0x47   :  { %784 = vmatpush3.bf16.msra.mxu1 %v783_v17  ;;  %754 = vmatprep.subr.bf16.mxu0 %v753_v18  ;;  %v805_v17 = vpack.c.bf16 %v391_v14, %v390_v12  ;;  %v775_v18 = vpack.c.bf16 %v343_v16, %v342_v15 }
  0x48   :  { %786 = vmatprep.subr.bf16.mxu1 %v785_v22  ;;  %v360_v22 = vld [vmem:[%s1446_s3 + $0xf0] sm:$0xff] }
  0x49   :  { %v777_v25 = vpack.c.bf16 %v361_v23, %v360_v22 }
  0x4a   :  { %756 = vmatpush3.bf16.msra.mxu0 %v755_v28  ;;  %v345_v28 = vld [vmem:[%s1446_s3 + $0x78] sm:$0xff] }
  0x4b   :  { %788 = vmatpush3.bf16.msra.mxu1 %v787_v29  ;;  %758 = vmatprep.subr.bf16.mxu0 %v757_v30  ;;  %v809_v29 = vpack.c.bf16 %v393_v26, %v392_v24  ;;  %v779_v30 = vpack.c.bf16 %v345_v28, %v344_v27 }
  0x4c   :  { %790 = vmatprep.subr.bf16.mxu1 %v789_v33  ;;  %v811_v33 = vpack.c.bf16 %v377_v32, %v376_v31 }
  0x4e   :  { %760 = vmatpush3.bf16.msra.mxu0 %v759_v36  ;;  %v154_v36 = vsub.s32 0, %v153_v35 }
  0x4f   :  { %792 = vmatpush3.bf16.msra.mxu1 %v791_v37  ;;  %762 = vmatprep.subr.bf16.mxu0 %v761_v41  ;;  %v150_v37 = vld [vmem:[%s1447_s2] sm:$0xf] }
  0x50   :  { %794 = vmatprep.subr.bf16.mxu1 %v793_v45  ;;  %v155_v41 = vrot.slane %v150_v37, %v154_v36  ;;  %v163_v42 = vrot.slane %v150_v37, %v162_v38  ;;  %v159_v43 = vrot.slane %v150_v37, %v158_v39  ;;  %v167_v44 = vrot.slane %v150_v37, %v166_v40 }
  0x52   :  { %764 = vmatpush3.bf16.msra.mxu0 %v763_v46 }
  0x53   :  { %796 = vmatpush3.bf16.msra.mxu1 %v795_v49  ;;  %766 = vmatprep.subr.bf16.mxu0 %v765_v53 }
  0x54   :  { %798 = vmatprep.subr.bf16.mxu1 %v797_v57 }
  0x56   :  { %768 = vmatpush3.bf16.msra.mxu0 %v767_v58 }
  0x57   :  { %800 = vmatpush3.bf16.msra.mxu1 %v799_v61  ;;  %770 = vmatprep.subr.bf16.mxu0 %v769_v1 }
  0x58   :  { %802 = vmatprep.subr.bf16.mxu1 %v801_v5 }
  0x5a   :  { %772 = vmatpush3.bf16.msra.mxu0 %v771_v6 }
  0x5b   :  { %804 = vmatpush3.bf16.msra.mxu1 %v803_v9  ;;  %774 = vmatprep.subr.bf16.mxu0 %v773_v13 }
  0x5c   :  { %806 = vmatprep.subr.bf16.mxu1 %v805_v17 }
  0x5e   :  { %776 = vmatpush3.bf16.msra.mxu0 %v775_v18 }
  0x5f   :  { %808 = vmatpush3.bf16.msra.mxu1 %v807_v21  ;;  %778 = vmatprep.subr.bf16.mxu0 %v777_v25 }
  0x60   :  { %810 = vmatprep.subr.bf16.mxu1 %v809_v29 }
  0x62   :  { %780 = vmatpush3.bf16.msra.mxu0 %v779_v30 }
  0x63   :  { %812 = vmatpush3.bf16.msra.mxu1 %v811_v33 }
 0x118   :  { %v238_v45 = vpop.f32.mrb[0].mxu0 }
 0x119   :  { %v239_v46 = vadd.f32 %v238_v45, %v155_v41  ;;  %v309_v47 = vpop.f32.mrb[0].mxu1  ;;  %v240_v48 = vpop.f32.mrb[1].mxu0 }
 0x11a   :  { %v310_v49 = vadd.f32 %v309_v47, %v163_v42  ;;  %v241_v50 = vadd.f32 %v240_v48, %v159_v43  ;;  %v311_v51 = vpop.f32.mrb[1].mxu1 }
 0x11b   :  { %v314_v52 = vmul.f32 0.5, %v239_v46  ;;  %v312_v53 = vadd.f32 %v311_v51, %v167_v44 }
 0x11c   :  { %v316_v54 = vmul.f32 0.5, %v310_v49  ;;  %v315_v55 = vmul.f32 0.5, %v241_v50 }
 0x11d   :  { %813 = vtanh.f32 %v314_v52  ;;  %v317_v56 = vmul.f32 0.5, %v312_v53 }
 0x11e   :  { %815 = vtanh.f32 %v316_v54 }
 0x11f   :  { %817 = vtanh.f32 %v315_v55 }
 0x120   :  { %819 = vtanh.f32 %v317_v56 }
 0x127   :  { %v814_v57 = vpop.eup %813 }
 0x128   :  { %v816_v58 = vpop.eup %815  ;;  %v322_v60 = vmul.f32 0.5, %v814_v57 }
 0x129   :  { %v818_v59 = vpop.eup %817  ;;  %v324_v61 = vmul.f32 0.5, %v816_v58 }
 0x12a   :  { %v820_v62 = vpop.eup %819  ;;  %v323_v63 = vmul.f32 0.5, %v818_v59  ;;  %v326_v3 = vadd.f32 0.5, %v322_v60 }
 0x12b   :  { %v325_v0 = vmul.f32 0.5, %v820_v62  ;;  %v328_v1 = vadd.f32 0.5, %v324_v61 }
 0x12c   :  { %v327_v2 = vadd.f32 0.5, %v323_v63 }
 0x12d   :  { %v329_v4 = vadd.f32 0.5, %v325_v0 }
 0x12e   :  { %465 = vmatprep.mubr.f32.mxu0 %v327_v2 }
 0x12f   :  { %535 = vmatprep.mubr.f32.mxu1 %v329_v4  ;;  %466 = vmatmul.mubr.f32.vlgmr.msra.gmra.mrb[2].mxu0 %v326_v3 }
 0x130   :  { %536 = vmatmul.mubr.f32.vlgmr.msra.gmra.mrb[2].mxu1 %v328_v1 }
 0x202   :  { %v583_v5 = vpop.f32.mrb[2].mxu0 }
 0x203   :  { %v618_v6 = vpop.f32.mrb[2].mxu1  ;;  %v584_v8 = vpop.f32.mrb[3].mxu0 }
 0x204   :  { %v585_v9 = vadd.f32 %v584_v8, %v583_v5  ;;  %v619_v10 = vpop.f32.mrb[3].mxu1 }
 0x205   :  { %v620_v11 = vadd.f32 %v619_v10, %v618_v6 }
 0x206   :  { %v468_v12 = vadd.f32 %v585_v9, %v550_v7 }
 0x208   :  { %v538_v13 = vadd.f32 %v620_v11, %v468_v12 }
 0x20a   :  { %v541_v14 = vmul.f32 0.5, %v538_v13 }
 0x20c   :  { %821 = vtanh.f32 %v541_v14 }
 0x216   :  { %v822_v15 = vpop.eup %821 }
 0x217   :  { %v543_v16 = vmul.f32 0.5, %v822_v15 }
 0x219   :  { %v544_v17 = vadd.f32 0.5, %v543_v16 }
 0x21b   :  { %545 = vst [vmem:[%s1449_s5] sm:$0xff] %v544_v17 }

</bundles_post_ra>
